<compile_context>
chip_gen: v5e
topology: v5e:2x2
jax: 0.10.0
libtpu: 0.0.40
codegen_flags: <defaults>
</compile_context>

<pallas_src>
import jax
import jax.numpy as jnp
import numpy as np
from jax import lax
from jax.experimental import pallas as pl
from jax.experimental.pallas import tpu as pltpu

K = 5            # conv kernel size
PAD = 2          # conv padding (both convs)
_TAP_STRIDE = 16            # lane stride between packed per-tap weight blocks
_B2_COL = _TAP_STRIDE * K   # lane column holding conv2 bias scalar


def _make_kernel(L, Lp, cin, cmid):
    inv_L = 1.0 / float(L)

    def cnn_kernel(x_ref, p_ref, out_ref):
        """Whole forward pass, all batches at once.

        x_ref   : (cin+1, Npad) zero-padded per-batch sequences concatenated
                  along lanes; row `cin` is the valid-column mask (1.0/0.0).
        p_ref   : (8, 128) packed parameters:
                    rows 0..3, cols [16k, 16k+8): W1[:, :, k]
                    rows 0..3, col  16*PAD+8    : b1 (bias folded via mask row)
                    row  4,    cols [16k, 16k+4): W2[0, :, k]
                    row  4,    col  80          : b2
        out_ref : (1, Bpad) outputs, batch on lanes (first B valid).
        """
        npad = x_ref.shape[1]
        bpad = out_ref.shape[1]

        x_aug = x_ref[...]                              # (cin+1, Npad)
        params = p_ref[...]                             # (8, 128)
        mask = x_aug[cin:cin + 1, :]                    # (1, Npad) valid cols

        # --- conv1 (8->4, k=5, pad=2): 5 accumulating tap dots --------------
        # Tap k of a valid column p reads column p + k - PAD, which stays
        # inside the same zero-padded batch segment because 2*PAD >= K-1.
        # Bias is folded into the center tap (weight col `cin` * mask row).
        acc1 = None
        for k in range(K):
            xk = x_aug if k == PAD else pltpu.roll(
                x_aug, shift=(PAD - k) % npad, axis=1)
            w1k = params[0:cmid, _TAP_STRIDE * k:_TAP_STRIDE * k + cin + 1]
            t = jnp.dot(w1k, xk, preferred_element_type=jnp.float32)
            acc1 = t if acc1 is None else acc1 + t
        # Pad columns MUST be zeroed: conv2 emulates zero padding by reading
        # them, but the rolled conv1 taps produce nonzero "phantom" conv
        # outputs there.  One (4, Npad) VPU multiply.
        h1 = jnp.maximum(acc1, 0.0) * mask              # (cmid, Npad)

        # --- conv2 (4->1, k=5, pad=2): 5 accumulating tap dots + scalar bias
        acc2 = None
        for k in range(K):
            hk = h1 if k == PAD else pltpu.roll(
                h1, shift=(PAD - k) % npad, axis=1)
            w2k = params[cmid:cmid + 1, _TAP_STRIDE * k:_TAP_STRIDE * k + cmid]
            t = jnp.dot(w2k, hk, preferred_element_type=jnp.float32)
            acc2 = t if acc2 is None else acc2 + t
        b2 = params[cmid:cmid + 1, _B2_COL:_B2_COL + 1]  # (1, 1)
        # h2 pad columns may be garbage; the segment reduction below only
        # selects valid columns, so they never reach the output.
        h2 = jnp.maximum(acc2 + b2, 0.0)                 # (1, Npad)

        # --- per-batch reductions: one lane-reducing matmul ------------------
        # Segment-selection matrix generated in-register (no HBM input):
        # seg[p, b] = 1 iff column p is a valid column of batch b.
        l = x_aug[5:6, :]                                # channel 5 (pad cols are 0)
        ind = (jnp.abs(l) > 1e-6).astype(jnp.float32)    # (1, Npad)
        stacked = jnp.concatenate([l, ind, h2], axis=0)  # (3, Npad)

        pos = lax.broadcasted_iota(jnp.int32, (npad, bpad), 0)
        bidx = lax.broadcasted_iota(jnp.int32, (npad, bpad), 1)
        off = pos - bidx * Lp
        seg = jnp.where((off >= PAD) & (off < PAD + L), 1.0, 0.0)  # (Npad, Bpad)

        red = jnp.dot(stacked, seg, preferred_element_type=jnp.float32)  # (3, Bpad)
        loss = red[0:1, :] / jnp.maximum(red[1:2, :], 1.0)
        out_ref[...] = loss + red[2:3, :] * inv_L        # (1, Bpad)

    return cnn_kernel


@jax.jit
def cnn_forward(feat, w1, b1, w2, b2):
    """feat: (B, 8, L) float32. Returns (B,) float32."""
    B, Cin, L = feat.shape
    Cmid = w1.shape[0]          # 4
    Lp = L + 2 * PAD
    N = B * Lp
    Npad = ((N + 127) // 128) * 128            # lane-dense slab width
    Bpad = ((B + 127) // 128) * 128            # lane-dense output width

    # The in-register roll trick requires every tap of a valid column to stay
    # inside its own zero-padded segment (no cross-batch reads).
    assert 2 * PAD >= K - 1, "roll-based conv taps would read adjacent batch"

    # ---- layout plumbing (XLA side, cheap) -------------------------------
    # zero-pad length, concatenate batches along lanes: (Cin, B*Lp) -> (Cin,Npad)
    xp = jnp.pad(feat, ((0, 0), (0, 0), (PAD, PAD)))                 # (B,Cin,Lp)
    xslab = jnp.transpose(xp, (1, 0, 2)).reshape(Cin, N)
    xslab = jnp.pad(xslab, ((0, 0), (0, Npad - N)))                  # (Cin,Npad)

    pos = jnp.arange(Npad)
    within = pos % Lp
    valid = (pos < N) & (within >= PAD) & (within < PAD + L)
    mask = valid.astype(jnp.float32)[None, :]                        # (1, Npad)
    x_aug = jnp.concatenate([xslab, mask], axis=0)                   # (Cin+1,Npad)

    # ---- pack all parameters into one (8, 128) slab ----------------------
    P = jnp.zeros((8, 128), jnp.float32)
    for k in range(K):
        P = P.at[0:Cmid, _TAP_STRIDE * k:_TAP_STRIDE * k + Cin].set(w1[:, :, k])
        P = P.at[Cmid, _TAP_STRIDE * k:_TAP_STRIDE * k + Cmid].set(w2[0, :, k])
    P = P.at[0:Cmid, _TAP_STRIDE * PAD + Cin].set(b1)   # b1 folded via mask row
    P = P.at[Cmid, _B2_COL].set(b2[0])

    # TODO(synk): for large B/L, tile the grid over batch blocks (mark that
    # axis "parallel" for the v7x 2-TC megacore) and/or use
    # pipeline_mode=pl.Buffered(...) / vmem_limit_bytes for the big slab; at
    # this toy size a single grid point is launch/DMA-overhead bound anyway.
    out = pl.pallas_call(
        _make_kernel(L, Lp, Cin, Cmid),
        out_shape=jax.ShapeDtypeStruct((1, Bpad), jnp.float32),
        grid_spec=pltpu.PrefetchScalarGridSpec(
            num_scalar_prefetch=0,
            grid=(1,),
            in_specs=[
                pl.BlockSpec((Cin + 1, Npad), lambda i: (0, 0)),
                pl.BlockSpec((8, 128), lambda i: (0, 0)),
            ],
            out_specs=pl.BlockSpec((1, Bpad), lambda i: (0, 0)),
        ),
        compiler_params=pltpu.CompilerParams(
            dimension_semantics=("arbitrary",)),
    )(x_aug, P)
    return out[0, :B]


def cnn_reference(feat, w1, b1, w2, b2):
    """Pure-JAX reference for correctness checking."""
    l = feat[:, 5, :]
    m = jnp.maximum(jnp.sum((jnp.abs(l) > 1e-6).astype(jnp.float32), axis=1), 1.0)
    loss = jnp.sum(l, axis=1) / m
    dn = ('NCH', 'OIH', 'NCH')
    x = lax.conv_general_dilated(feat, w1, (1,), ((PAD, PAD),), dimension_numbers=dn)
    x = jax.nn.relu(x + b1[None, :, None])
    x = lax.conv_general_dilated(x, w2, (1,), ((PAD, PAD),), dimension_numbers=dn)
    x = jax.nn.relu(x + b2[None, :, None])
    return loss + jnp.mean(x, axis=-1)[:, 0]


if __name__ == "__main__":
    key = jax.random.PRNGKey(0)
    k1, k2, k3, k4, k5 = jax.random.split(key, 5)

    # Deterministic synthetic parameters (shapes from nn.Conv1d inits).
    w1 = jax.random.normal(k1, (4, 8, K), jnp.float32) * 0.2
    b1 = jax.random.normal(k2, (4,), jnp.float32) * 0.1
    w2 = jax.random.normal(k3, (1, 4, K), jnp.float32) * 0.2
    b2 = jax.random.normal(k4, (1,), jnp.float32) * 0.1

    # Small input consistent with forward(): (B, 8, C) with B=2, C=16.
    feat = jax.random.normal(k5, (2, 8, 16), jnp.float32)

    out = cnn_forward(feat, w1, b1, w2, b2)
    out = jax.block_until_ready(out)

    ref = cnn_reference(feat, w1, b1, w2, b2)
    assert out.shape == (2,)
    np.testing.assert_allclose(np.asarray(out), np.asarray(ref),
                               rtol=1e-4, atol=1e-5)
    print("KERNEL_OK")
</pallas_src>

<mosaic_0001>
module attributes {stable_mosaic.version = 11 : i64} {
  func.func @cnn_kernel(%arg0: i32, %arg1: memref<9x128xf32, #tpu.memory_space<vmem>>, %arg2: memref<8x128xf32, #tpu.memory_space<vmem>>, %arg3: memref<1x128xf32, #tpu.memory_space<vmem>>) attributes {dimension_semantics = [#tpu.dimension_semantics<arbitrary>], iteration_bounds = array<i64: 1>, scalar_prefetch = 0 : i64, scratch_operands = 0 : i64, tpu.core_type = #tpu.core_type<tc>, window_params = [{pipeline_mode = #tpu.pipeline_mode<synchronous>, transform_indices = @transform_0, window_bounds = array<i64: 9, 128>}, {pipeline_mode = #tpu.pipeline_mode<synchronous>, transform_indices = @transform_1, window_bounds = array<i64: 8, 128>}, {pipeline_mode = #tpu.pipeline_mode<synchronous>, transform_indices = @transform_2, window_bounds = array<i64: 1, 128>}]} {
    %c0 = arith.constant 0 : index
    %c0_0 = arith.constant 0 : index
    %0 = vector.load %arg1[%c0, %c0_0] : memref<9x128xf32, #tpu.memory_space<vmem>>, vector<9x128xf32>
    %c0_1 = arith.constant 0 : index
    %c0_2 = arith.constant 0 : index
    %1 = vector.load %arg2[%c0_1, %c0_2] : memref<8x128xf32, #tpu.memory_space<vmem>>, vector<8x128xf32>
    %2 = vector.extract_strided_slice %0 {offsets = [8, 0], sizes = [1, 128], strides = [1, 1]} : vector<9x128xf32> to vector<1x128xf32>
    %c2_i32 = arith.constant 2 : i32
    %3 = tpu.dynamic_rotate %0 by %c2_i32 dim 1 : vector<9x128xf32>, i32 -> vector<9x128xf32>
    %4 = vector.extract_strided_slice %1 {offsets = [0, 0], sizes = [4, 9], strides = [1, 1]} : vector<8x128xf32> to vector<4x9xf32>
    %cst = arith.constant dense<0.000000e+00> : vector<4x128xf32>
    %5 = tpu.matmul %4, %3, %cst {dimension_numbers = #tpu.dot_dimension_numbers<[1], [0], [0], [1], [0, 0, 1, 1], [], []>} : vector<4x9xf32>, vector<9x128xf32>, vector<4x128xf32> -> vector<4x128xf32>
    %c1_i32 = arith.constant 1 : i32
    %6 = tpu.dynamic_rotate %0 by %c1_i32 dim 1 : vector<9x128xf32>, i32 -> vector<9x128xf32>
    %7 = vector.extract_strided_slice %1 {offsets = [0, 16], sizes = [4, 9], strides = [1, 1]} : vector<8x128xf32> to vector<4x9xf32>
    %cst_3 = arith.constant dense<0.000000e+00> : vector<4x128xf32>
    %8 = tpu.matmul %7, %6, %cst_3 {dimension_numbers = #tpu.dot_dimension_numbers<[1], [0], [0], [1], [0, 0, 1, 1], [], []>} : vector<4x9xf32>, vector<9x128xf32>, vector<4x128xf32> -> vector<4x128xf32>
    %9 = arith.addf %5, %8 : vector<4x128xf32>
    %10 = vector.extract_strided_slice %1 {offsets = [0, 32], sizes = [4, 9], strides = [1, 1]} : vector<8x128xf32> to vector<4x9xf32>
    %cst_4 = arith.constant dense<0.000000e+00> : vector<4x128xf32>
    %11 = tpu.matmul %10, %0, %cst_4 {dimension_numbers = #tpu.dot_dimension_numbers<[1], [0], [0], [1], [0, 0, 1, 1], [], []>} : vector<4x9xf32>, vector<9x128xf32>, vector<4x128xf32> -> vector<4x128xf32>
    %12 = arith.addf %9, %11 : vector<4x128xf32>
    %c127_i32 = arith.constant 127 : i32
    %13 = tpu.dynamic_rotate %0 by %c127_i32 dim 1 : vector<9x128xf32>, i32 -> vector<9x128xf32>
    %14 = vector.extract_strided_slice %1 {offsets = [0, 48], sizes = [4, 9], strides = [1, 1]} : vector<8x128xf32> to vector<4x9xf32>
    %cst_5 = arith.constant dense<0.000000e+00> : vector<4x128xf32>
    %15 = tpu.matmul %14, %13, %cst_5 {dimension_numbers = #tpu.dot_dimension_numbers<[1], [0], [0], [1], [0, 0, 1, 1], [], []>} : vector<4x9xf32>, vector<9x128xf32>, vector<4x128xf32> -> vector<4x128xf32>
    %16 = arith.addf %12, %15 : vector<4x128xf32>
    %c126_i32 = arith.constant 126 : i32
    %17 = tpu.dynamic_rotate %0 by %c126_i32 dim 1 : vector<9x128xf32>, i32 -> vector<9x128xf32>
    %18 = vector.extract_strided_slice %1 {offsets = [0, 64], sizes = [4, 9], strides = [1, 1]} : vector<8x128xf32> to vector<4x9xf32>
    %cst_6 = arith.constant dense<0.000000e+00> : vector<4x128xf32>
    %19 = tpu.matmul %18, %17, %cst_6 {dimension_numbers = #tpu.dot_dimension_numbers<[1], [0], [0], [1], [0, 0, 1, 1], [], []>} : vector<4x9xf32>, vector<9x128xf32>, vector<4x128xf32> -> vector<4x128xf32>
    %20 = arith.addf %16, %19 : vector<4x128xf32>
    %cst_7 = arith.constant 0.000000e+00 : f32
    %21 = vector.broadcast %cst_7 : f32 to vector<4x128xf32>
    %22 = arith.maximumf %20, %21 : vector<4x128xf32>
    %23 = vector.broadcast %2 : vector<1x128xf32> to vector<4x128xf32>
    %24 = arith.mulf %22, %23 : vector<4x128xf32>
    %c2_i32_8 = arith.constant 2 : i32
    %25 = tpu.dynamic_rotate %24 by %c2_i32_8 dim 1 : vector<4x128xf32>, i32 -> vector<4x128xf32>
    %26 = vector.extract_strided_slice %1 {offsets = [4, 0], sizes = [1, 4], strides = [1, 1]} : vector<8x128xf32> to vector<1x4xf32>
    %cst_9 = arith.constant dense<0.000000e+00> : vector<1x128xf32>
    %27 = tpu.matmul %26, %25, %cst_9 {dimension_numbers = #tpu.dot_dimension_numbers<[1], [0], [0], [1], [0, 0, 1, 1], [], []>} : vector<1x4xf32>, vector<4x128xf32>, vector<1x128xf32> -> vector<1x128xf32>
    %c1_i32_10 = arith.constant 1 : i32
    %28 = tpu.dynamic_rotate %24 by %c1_i32_10 dim 1 : vector<4x128xf32>, i32 -> vector<4x128xf32>
    %29 = vector.extract_strided_slice %1 {offsets = [4, 16], sizes = [1, 4], strides = [1, 1]} : vector<8x128xf32> to vector<1x4xf32>
    %cst_11 = arith.constant dense<0.000000e+00> : vector<1x128xf32>
    %30 = tpu.matmul %29, %28, %cst_11 {dimension_numbers = #tpu.dot_dimension_numbers<[1], [0], [0], [1], [0, 0, 1, 1], [], []>} : vector<1x4xf32>, vector<4x128xf32>, vector<1x128xf32> -> vector<1x128xf32>
    %31 = arith.addf %27, %30 : vector<1x128xf32>
    %32 = vector.extract_strided_slice %1 {offsets = [4, 32], sizes = [1, 4], strides = [1, 1]} : vector<8x128xf32> to vector<1x4xf32>
    %cst_12 = arith.constant dense<0.000000e+00> : vector<1x128xf32>
    %33 = tpu.matmul %32, %24, %cst_12 {dimension_numbers = #tpu.dot_dimension_numbers<[1], [0], [0], [1], [0, 0, 1, 1], [], []>} : vector<1x4xf32>, vector<4x128xf32>, vector<1x128xf32> -> vector<1x128xf32>
    %34 = arith.addf %31, %33 : vector<1x128xf32>
    %c127_i32_13 = arith.constant 127 : i32
    %35 = tpu.dynamic_rotate %24 by %c127_i32_13 dim 1 : vector<4x128xf32>, i32 -> vector<4x128xf32>
    %36 = vector.extract_strided_slice %1 {offsets = [4, 48], sizes = [1, 4], strides = [1, 1]} : vector<8x128xf32> to vector<1x4xf32>
    %cst_14 = arith.constant dense<0.000000e+00> : vector<1x128xf32>
    %37 = tpu.matmul %36, %35, %cst_14 {dimension_numbers = #tpu.dot_dimension_numbers<[1], [0], [0], [1], [0, 0, 1, 1], [], []>} : vector<1x4xf32>, vector<4x128xf32>, vector<1x128xf32> -> vector<1x128xf32>
    %38 = arith.addf %34, %37 : vector<1x128xf32>
    %c126_i32_15 = arith.constant 126 : i32
    %39 = tpu.dynamic_rotate %24 by %c126_i32_15 dim 1 : vector<4x128xf32>, i32 -> vector<4x128xf32>
    %40 = vector.extract_strided_slice %1 {offsets = [4, 64], sizes = [1, 4], strides = [1, 1]} : vector<8x128xf32> to vector<1x4xf32>
    %cst_16 = arith.constant dense<0.000000e+00> : vector<1x128xf32>
    %41 = tpu.matmul %40, %39, %cst_16 {dimension_numbers = #tpu.dot_dimension_numbers<[1], [0], [0], [1], [0, 0, 1, 1], [], []>} : vector<1x4xf32>, vector<4x128xf32>, vector<1x128xf32> -> vector<1x128xf32>
    %42 = arith.addf %38, %41 : vector<1x128xf32>
    %43 = vector.extract_strided_slice %1 {offsets = [4, 80], sizes = [1, 1], strides = [1, 1]} : vector<8x128xf32> to vector<1x1xf32>
    %44 = vector.broadcast %43 : vector<1x1xf32> to vector<1x128xf32>
    %45 = arith.addf %42, %44 : vector<1x128xf32>
    %cst_17 = arith.constant 0.000000e+00 : f32
    %46 = vector.broadcast %cst_17 : f32 to vector<1x128xf32>
    %47 = arith.maximumf %45, %46 : vector<1x128xf32>
    %48 = vector.extract_strided_slice %0 {offsets = [5, 0], sizes = [1, 128], strides = [1, 1]} : vector<9x128xf32> to vector<1x128xf32>
    %49 = math.absf %48 : vector<1x128xf32>
    %cst_18 = arith.constant 9.99999997E-7 : f32
    %50 = vector.broadcast %cst_18 : f32 to vector<1x128xf32>
    %51 = arith.cmpf ogt, %49, %50 : vector<1x128xf32>
    %52 = arith.extui %51 : vector<1x128xi1> to vector<1x128xi32>
    %53 = arith.sitofp %52 : vector<1x128xi32> to vector<1x128xf32>
    %54 = tpu.concatenate %48, %53, %47 in 0 : vector<1x128xf32>, vector<1x128xf32>, vector<1x128xf32> -> vector<3x128xf32>
    %55 = tpu.iota {dimensions = array<i32: 0>} : vector<128x128xi32>
    %56 = tpu.iota {dimensions = array<i32: 1>} : vector<128x128xi32>
    %c20_i32 = arith.constant 20 : i32
    %57 = vector.broadcast %c20_i32 : i32 to vector<128x128xi32>
    %58 = arith.muli %56, %57 : vector<128x128xi32>
    %59 = arith.subi %55, %58 : vector<128x128xi32>
    %c2_i32_19 = arith.constant 2 : i32
    %60 = vector.broadcast %c2_i32_19 : i32 to vector<128x128xi32>
    %61 = arith.cmpi sge, %59, %60 : vector<128x128xi32>
    %c18_i32 = arith.constant 18 : i32
    %62 = vector.broadcast %c18_i32 : i32 to vector<128x128xi32>
    %63 = arith.cmpi slt, %59, %62 : vector<128x128xi32>
    %64 = arith.andi %61, %63 : vector<128x128xi1>
    %cst_20 = arith.constant 1.000000e+00 : f32
    %cst_21 = arith.constant 0.000000e+00 : f32
    %65 = vector.broadcast %cst_20 : f32 to vector<128x128xf32>
    %66 = vector.broadcast %cst_21 : f32 to vector<128x128xf32>
    %67 = arith.select %64, %65, %66 : vector<128x128xi1>, vector<128x128xf32>
    %cst_22 = arith.constant dense<0.000000e+00> : vector<3x128xf32>
    %68 = tpu.matmul %54, %67, %cst_22 {dimension_numbers = #tpu.dot_dimension_numbers<[1], [0], [0], [1], [0, 0, 1, 1], [], []>} : vector<3x128xf32>, vector<128x128xf32>, vector<3x128xf32> -> vector<3x128xf32>
    %69 = vector.extract_strided_slice %68 {offsets = [0, 0], sizes = [1, 128], strides = [1, 1]} : vector<3x128xf32> to vector<1x128xf32>
    %70 = vector.extract_strided_slice %68 {offsets = [1, 0], sizes = [1, 128], strides = [1, 1]} : vector<3x128xf32> to vector<1x128xf32>
    %cst_23 = arith.constant 1.000000e+00 : f32
    %71 = vector.broadcast %cst_23 : f32 to vector<1x128xf32>
    %72 = arith.maximumf %70, %71 : vector<1x128xf32>
    %73 = arith.divf %69, %72 : vector<1x128xf32>
    %74 = vector.extract_strided_slice %68 {offsets = [2, 0], sizes = [1, 128], strides = [1, 1]} : vector<3x128xf32> to vector<1x128xf32>
    %cst_24 = arith.constant 6.250000e-02 : f32
    %75 = vector.broadcast %cst_24 : f32 to vector<1x128xf32>
    %76 = arith.mulf %74, %75 : vector<1x128xf32>
    %77 = arith.addf %73, %76 : vector<1x128xf32>
    %c0_25 = arith.constant 0 : index
    %c0_26 = arith.constant 0 : index
    %78 = vector.load %arg3[%c0_25, %c0_26] : memref<1x128xf32, #tpu.memory_space<vmem>>, vector<1x128xf32>
    tpu.vector_store %arg3[%c0_25, %c0_26], %77 {strides = array<i32>} : memref<1x128xf32, #tpu.memory_space<vmem>>, vector<1x128xf32>,
    return
  }
  func.func @transform_0(%arg0: i32) -> (i32, i32) {
    %c0_i32 = arith.constant 0 : i32
    %c0_i32_0 = arith.constant 0 : i32
    %c0_i32_1 = arith.constant 0 : i32
    return %c0_i32, %c0_i32_0 : i32, i32
  }
  func.func @transform_1(%arg0: i32) -> (i32, i32) {
    %c0_i32 = arith.constant 0 : i32
    %c0_i32_0 = arith.constant 0 : i32
    %c0_i32_1 = arith.constant 0 : i32
    return %c0_i32, %c0_i32_0 : i32, i32
  }
  func.func @transform_2(%arg0: i32) -> (i32, i32) {
    %c0_i32 = arith.constant 0 : i32
    %c0_i32_0 = arith.constant 0 : i32
    %c0_i32_1 = arith.constant 0 : i32
    return %c0_i32, %c0_i32_0 : i32, i32
  }
}

</mosaic_0001>

<bundles_post_ra>
// kernel: cnn_forward.1
= control target key start
LH: loop header
LB: loop body
LE: loop exit
PB: predicated region body
PF: predicated region fallthrough
CT: control target
= control target key end

     0   :  { %vm28_vm0 = vcmask 1040384   ;;  %s544_s15 = smov 96   ;;  %s545_s16 = smov 127   ;;  %vm25_vm1 = vcmask 72704   ;;  %vm182_vm2 = vcmask 1043456   ;;  %vm179_vm3 = vcmask 31744   ;;  %s703_s1 = inlined_call_operand.vmem [shape: f32[8,128], index: 1, kind: input, shape index: {}]   ;;  %s704_s0 = inlined_call_operand.vmem [shape: f32[9,128], index: 0, kind: input, shape index: {}]   ;;  %s705_s2 = inlined_call_operand.vmem [shape: f32[1,128], index: 2, kind: output, shape index: {}]  }
   0x1   :  { %v573_v0 = vld [vmem:[%s703_s1] sm:$0xff]  ;;  %v12_v1 = vld [vmem:[%s704_s0 + $0x8] sm:$0x1]  ;;  %s546_s17 = smov 1   ;;  %s547_s1 = smov 2   ;;  %v342_v30 = vlaneseq  ;;  %v552_v31 = vmov 80  }
   0x2   :  { %v581_v2 = vld [vmem:[%s704_s0] sm:$0xff]  ;;  %77 = vrot.lane.b32.xlu0 %v573_v0, %s544_s15  ;;  %107 = vrot.lane.b32.xlu1 %v12_v1, %s545_s16  ;;  %s548_s18 = smov 80   ;;  %s549_s19 = smov 112   ;;  %v616_v15 = vrot.slane %v573_v0, 4  ;;  %v541_v25 = vld [vmem:[%s704_s0 + $0x8] ss:$0 sm:$0xff] }
   0x3   :  { %18 = vrot.lane.b32.xlu2 %v581_v2, %s546_s17  ;;  %495 = vmatpush.msk.msra.mxu3 %vm28_vm0, %v12_v1  ;;  %s550_s20 = smov 126   ;;  %s551_s21 = smov 64   ;;  %v637_v32 = vshrl.u32 %v342_v30, 7  ;;  %v360_v33 = vand.u32 127, %v342_v30  ;;  %v553_v43 = vmov 1.0  }
   0x4   :  { %539 = vset.pattern.permute.xlu2 %v552_v31  ;;  %540 = vset.pattern.permute.xlu0 %v552_v31 }
   0x5   :  { %99 = vmatpush.msra.mxu3 %v581_v2  ;;  %v358_v34 = vadd.s32 120, %v637_v32  ;;  %v640_v35 = vmul.u32 20, %v360_v33  ;;  %v357_v36 = vadd.s32 112, %v637_v32  ;;  %v356_v37 = vadd.s32 104, %v637_v32 }
   0x6   :  { %v355_v38 = vadd.s32 96, %v637_v32  ;;  %v354_v50 = vadd.s32 88, %v637_v32  ;;  %v353_v52 = vadd.s32 80, %v637_v32  ;;  %v352_v54 = vadd.s32 72, %v637_v32 }
   0x7   :  { %v377_v39 = vsub.s32 %v358_v34, %v640_v35  ;;  %v376_v40 = vsub.s32 %v357_v36, %v640_v35  ;;  %v375_v41 = vsub.s32 %v356_v37, %v640_v35  ;;  %v351_v56 = vadd.s32 64, %v637_v32 }
   0x8   :  { %v374_v42 = vsub.s32 %v355_v38, %v640_v35  ;;  %v373_v51 = vsub.s32 %v354_v50, %v640_v35  ;;  %v372_v53 = vsub.s32 %v353_v52, %v640_v35  ;;  %v371_v55 = vsub.s32 %v352_v54, %v640_v35 }
   0x9   :  { %vm393_vm4 = vcmp.ge.s32.totalorder %v377_v39, 2  ;;  %vm409_vm5 = vcmp.lt.s32.totalorder %v377_v39, 18  ;;  %vm392_vm6 = vcmp.ge.s32.totalorder %v376_v40, 2  ;;  %vm408_vm7 = vcmp.lt.s32.totalorder %v376_v40, 18 }
   0xa   :  { %16 = vrot.lane.b32.xlu1 %v12_v1, %s547_s1  ;;  %20 = vrot.lane.b32.xlu0 %v12_v1, %s546_s17  ;;  %vm425_vm8 = vmand %vm393_vm4, %vm409_vm5  ;;  %vm391_vm9 = vcmp.ge.s32.totalorder %v375_v41, 2  ;;  %vm407_vm10 = vcmp.lt.s32.totalorder %v375_v41, 18  ;;  %vm390_vm12 = vcmp.ge.s32.totalorder %v374_v42, 2  ;;  %vm406_vm13 = vcmp.lt.s32.totalorder %v374_v42, 18 }
   0xb   :  { %105 = vrot.lane.b32.xlu2 %v581_v2, %s545_s16  ;;  %512 = vmatpush.msk.msra.mxu2 %vm425_vm8, %v553_v43  ;;  %vm424_vm11 = vmand %vm392_vm6, %vm408_vm7  ;;  %vm405_vm4 = vcmp.lt.s32.totalorder %v373_v51, 18  ;;  %vm388_vm6 = vcmp.ge.s32.totalorder %v372_v53, 2  ;;  %vm404_vm7 = vcmp.lt.s32.totalorder %v372_v53, 18  ;;  %vm403_vm8 = vcmp.lt.s32.totalorder %v371_v55, 18 }
   0xc   :  { %vm423_vm14 = vmand %vm391_vm9, %vm407_vm10  ;;  %v370_v57 = vsub.s32 %v351_v56, %v640_v35  ;;  %v350_v58 = vadd.s32 56, %v637_v32  ;;  %v349_v60 = vadd.s32 48, %v637_v32  ;;  %v348_v62 = vadd.s32 40, %v637_v32 }
   0xd   :  { %513 = vmatpush.msk.msra.mxu2 %vm424_vm11, %v553_v43  ;;  %vm422_vm15 = vmand %vm390_vm12, %vm406_vm13 }
   0xe   :  { %vm386_vm10 = vcmp.ge.s32.totalorder %v370_v57, 2  ;;  %vm402_vm11 = vcmp.lt.s32.totalorder %v370_v57, 18  ;;  %v369_v59 = vsub.s32 %v350_v58, %v640_v35  ;;  %v368_v61 = vsub.s32 %v349_v60, %v640_v35 }
   0xf   :  { %514 = vmatpush.msk.msra.mxu2 %vm423_vm14, %v553_v43  ;;  %vm418_vm12 = vmand %vm386_vm10, %vm402_vm11  ;;  %v367_v63 = vsub.s32 %v348_v62, %v640_v35 }
  0x10   :  { %vm385_vm13 = vcmp.ge.s32.totalorder %v369_v59, 2  ;;  %vm401_vm14 = vcmp.lt.s32.totalorder %v369_v59, 18 }
  0x11   :  { %515 = vmatpush.msk.msra.mxu2 %vm422_vm15, %v553_v43  ;;  %vm417_vm15 = vmand %vm385_vm13, %vm401_vm14 }
  0x12   :  { %109 = vrot.lane.b32.xlu1 %v573_v0, %s548_s18  ;;  %23 = vrot.lane.b32.xlu0 %v573_v0, %s549_s19 }
  0x13   :  { %14 = vrot.lane.b32.xlu2 %v581_v2, %s547_s1 }
  0x1a   :  { %139 = vrot.lane.b32.xlu0 %v12_v1, %s550_s20  ;;  %137 = vrot.lane.b32.xlu1 %v581_v2, %s550_s20 }
  0x1b   :  { %141 = vrot.lane.b32.xlu2 %v573_v0, %s551_s21 }
  0x22   :  { %231 = vrot.lane.b32.xlu1 %v616_v15, %s544_s15 }
  0x5d   :  { %v19_v3 = vpop.permute.xlu2 %18 }
  0x65   :  { %v106_v4 = vpop.permute.xlu2 %105 }
  0x6d   :  { %v15_v7 = vpop.permute.xlu2 %14 }
  0x74   :  { %v78_v5 = vpop.permute.xlu0 %77  ;;  %v108_v6 = vpop.permute.xlu1 %107 }
  0x75   :  { %496 = vmatmul.msk.f32.vlgmr.msra.gmra.mxu3 %vm25_vm1, %v78_v5  ;;  %v142_v14 = vpop.permute.xlu2 %141 }
  0x76   :  { %497 = vmatpush.msk.msrb.mxu3 %vm28_vm0, %v108_v6 }
  0x78   :  { %131 = vmatpush.msrb.mxu3 %v106_v4  ;;  %v345_v4 = vadd.s32 16, %v637_v32 }
  0x7a   :  { %v364_v6 = vsub.s32 %v345_v4, %v640_v35 }
  0x7c   :  { %v17_v8 = vpop.permute.xlu1 %16  ;;  %v21_v9 = vpop.permute.xlu0 %20  ;;  %vm380_vm13 = vcmp.ge.s32.totalorder %v364_v6, 2  ;;  %vm396_vm14 = vcmp.lt.s32.totalorder %v364_v6, 18 }
  0x7d   :  { %491 = vmatpush.msk.msra.mxu0 %vm28_vm0, %v21_v9  ;;  %493 = vmatpush.msk.msra.mxu1 %vm28_vm0, %v17_v8  ;;  %v362_v9 = vsub.s32 %v637_v32, %v640_v35 }
  0x7f   :  { %47 = vmatpush.msra.mxu0 %v19_v3  ;;  %72 = vmatpush.msra.mxu1 %v15_v7  ;;  %v346_v3 = vadd.s32 24, %v637_v32  ;;  %v344_v7 = vadd.s32 8, %v637_v32 }
  0x80   :  { %494 = vmatmul.msk.f32.vlgmr.msra.gmra.mxu1 %vm25_vm1, %v573_v0 }
  0x81   :  { %v365_v5 = vsub.s32 %v346_v3, %v640_v35  ;;  %v363_v8 = vsub.s32 %v344_v7, %v640_v35 }
  0x83   :  { %vm381_vm10 = vcmp.ge.s32.totalorder %v365_v5, 2  ;;  %vm397_vm11 = vcmp.lt.s32.totalorder %v365_v5, 18 }
  0x84   :  { %v110_v10 = vpop.permute.xlu1 %109  ;;  %v24_v11 = vpop.permute.xlu0 %23 }
  0x85   :  { %492 = vmatmul.msk.f32.vlgmr.msra.gmra.mxu0 %vm25_vm1, %v24_v11  ;;  %498 = vmatmul.msk.f32.vlgmr.msrb.gmra.mxu3 %vm25_vm1, %v110_v10 }
  0x8c   :  { %v140_v12 = vpop.permute.xlu0 %139  ;;  %v138_v13 = vpop.permute.xlu1 %137 }
  0x8d   :  { %499 = vmatpush.msk.msrb.mxu0 %vm28_vm0, %v140_v12 }
  0x8f   :  { %163 = vmatpush.msrb.mxu0 %v138_v13  ;;  %v326_v13 = vand.u32 2147483647, %v581_v2 }
  0x90   :  { %500 = vmatmul.msk.f32.vlgmr.msrb.gmra.mxu0 %vm25_vm1, %v142_v14  ;;  %vm389_vm1 = vcmp.ge.s32.totalorder %v373_v51, 2 }
  0x91   :  { %vm421_vm5 = vmand %vm389_vm1, %vm405_vm4  ;;  %vm384_vm1 = vcmp.ge.s32.totalorder %v368_v61, 2  ;;  %vm400_vm4 = vcmp.lt.s32.totalorder %v368_v61, 18 }
  0x92   :  { %516 = vmatpush.msk.msra.mxu2 %vm421_vm5, %v553_v43  ;;  %vm416_vm5 = vmand %vm384_vm1, %vm400_vm4  ;;  %vm379_vm1 = vcmp.ge.s32.totalorder %v363_v8, 2  ;;  %vm395_vm4 = vcmp.lt.s32.totalorder %v363_v8, 18 }
  0x94   :  { %v232_v28 = vpop.permute.xlu1 %231 }
  0xf8   :  { %v101_v16 = vpop.f32.mrf.mxu3 }
  0xfd   :  { %v74_v18 = vpop.f32.mrf.mxu1 }
 0x102   :  { %v49_v17 = vpop.f32.mrf.mxu0 }
 0x103   :  { %v75_v19 = vadd.f32 %v74_v18, %v49_v17 }
 0x105   :  { %v104_v21 = vadd.f32 %v101_v16, %v75_v19 }
 0x108   :  { %v133_v20 = vpop.f32.mrf.mxu3 }
 0x109   :  { %v136_v22 = vadd.f32 %v133_v20, %v104_v21  ;;  %v554_v20 = vmov 0.0  }
 0x10d   :  { %v165_v23 = vpop.f32.mrf.mxu0 }
 0x10e   :  { %v168_v24 = vadd.f32 %v165_v23, %v136_v22 }
 0x110   :  { %v169_v26 = vmax.f32 %v168_v24, 0.0  ;;  %v331_v24 = vrot.slane %v581_v2, 5 }
 0x112   :  { %v171_v27 = vmul.f32 %v541_v25, %v169_v26 }
 0x114   :  { %259 = vrot.lane.b32.xlu1 %v171_v27, %s545_s16  ;;  %174 = vrot.lane.b32.xlu2 %v171_v27, %s546_s17 }
 0x115   :  { %172 = vrot.lane.b32.xlu0 %v171_v27, %s547_s1  ;;  %505 = vmatpush.msk.msra.mxu3 %vm182_vm2, %v171_v27 }
 0x116   :  { %506 = vmatmul.msk.f32.vlgmr.msra.gmra.mxu3 %vm179_vm3, %v232_v28 }
 0x11c   :  { %291 = vrot.lane.b32.xlu1 %v616_v15, %s551_s21  ;;  %261 = vrot.lane.b32.xlu2 %v616_v15, %s548_s18 }
 0x11d   :  { %177 = vrot.lane.b32.xlu0 %v616_v15, %s549_s19 }
 0x124   :  { %320 = vperm.xlu2 %539, %v573_v0   ;;  %v347_v0 = vadd.s32 32, %v637_v32 }
 0x125   :  { %289 = vrot.lane.b32.xlu0 %v171_v27, %s550_s20 }
 0x126   :  { %v366_v1 = vsub.s32 %v347_v0, %v640_v35 }
 0x16e   :  { %v175_v29 = vpop.permute.xlu2 %174 }
 0x16f   :  { %501 = vmatpush.msk.msrb.mxu1 %vm182_vm2, %v175_v29 }
 0x176   :  { %v262_v47 = vpop.permute.xlu2 %261 }
 0x17e   :  { %v321_v17 = vpop.permute.xlu2 %320 }
 0x17f   :  { %v322_v19 = vrot.slane %v321_v17, 4 }
 0x186   :  { %v260_v44 = vpop.permute.xlu1 %259 }
 0x187   :  { %v173_v45 = vpop.permute.xlu0 %172 }
 0x188   :  { %503 = vmatpush.msk.msra.mxu0 %vm182_vm2, %v173_v45 }
 0x189   :  { %504 = vmatmul.msk.f32.vlgmr.msra.gmra.mxu0 %vm179_vm3, %v616_v15 }
 0x18a   :  { %507 = vmatpush.msk.msrb.mxu0 %vm182_vm2, %v260_v44 }
 0x18e   :  { %v292_v48 = vpop.permute.xlu1 %291 }
 0x18f   :  { %v178_v46 = vpop.permute.xlu0 %177 }
 0x190   :  { %502 = vmatmul.msk.f32.vlgmr.msrb.gmra.mxu1 %vm179_vm3, %v178_v46 }
 0x191   :  { %508 = vmatmul.msk.f32.vlgmr.msrb.gmra.mxu0 %vm179_vm3, %v262_v47 }
 0x197   :  { %v290_v49 = vpop.permute.xlu0 %289 }
 0x198   :  { %509 = vmatpush.msk.msra.mxu1 %vm182_vm2, %v290_v49  ;;  %vm420_vm2 = vmand %vm388_vm6, %vm404_vm7  ;;  %vm383_vm6 = vcmp.ge.s32.totalorder %v367_v63, 2  ;;  %vm399_vm7 = vcmp.lt.s32.totalorder %v367_v63, 18 }
 0x199   :  { %510 = vmatmul.msk.f32.vlgmr.msra.gmra.mxu1 %vm179_vm3, %v292_v48  ;;  %517 = vmatpush.msk.msra.mxu2 %vm420_vm2, %v553_v43  ;;  %vm387_vm3 = vcmp.ge.s32.totalorder %v371_v55, 2  ;;  %vm415_vm2 = vmand %vm383_vm6, %vm399_vm7  ;;  %vm378_vm6 = vcmp.ge.s32.totalorder %v362_v9, 2  ;;  %vm394_vm7 = vcmp.lt.s32.totalorder %v362_v9, 18  ;;  %v255_v14 = vpop.f32.mrf.mxu3 }
 0x19a   :  { %vm419_vm9 = vmand %vm387_vm3, %vm403_vm8  ;;  %vm382_vm3 = vcmp.ge.s32.totalorder %v366_v1, 2  ;;  %vm398_vm8 = vcmp.lt.s32.totalorder %v366_v1, 18 }
 0x19b   :  { %518 = vmatpush.msk.msra.mxu2 %vm419_vm9, %v553_v43  ;;  %vm414_vm9 = vmand %vm382_vm3, %vm398_vm8  ;;  %vm327_vm3 = vcmp.gt.f32.partialorder %v326_v13, 1e-06  ;;  %vm340_vm8 = vcmask 1041408  }
 0x19c   :  { %v511_v21 = vsel %vm327_vm3, 1.0, %v554_v20 }
 0x19d   :  { %519 = vmatpush.msk.msra.mxu2 %vm418_vm12, %v553_v43  ;;  %vm413_vm12 = vmand %vm381_vm10, %vm397_vm11  ;;  %v334_v25 = vrot.slane %v511_v21, 4 }
 0x19f   :  { %520 = vmatpush.msk.msra.mxu2 %vm417_vm15, %v553_v43  ;;  %vm412_vm15 = vmand %vm380_vm13, %vm396_vm14  ;;  %v339_v28 = vsel %vm28_vm0, %v331_v24, %v334_v25 }
 0x1a1   :  { %521 = vmatpush.msk.msra.mxu2 %vm416_vm5, %v553_v43  ;;  %vm411_vm5 = vmand %vm379_vm1, %vm395_vm4 }
 0x1a3   :  { %522 = vmatpush.msk.msra.mxu2 %vm415_vm2, %v553_v43  ;;  %vm410_vm2 = vmand %vm378_vm6, %vm394_vm7 }
 0x1a5   :  { %523 = vmatpush.msk.msra.mxu2 %vm414_vm9, %v553_v43 }
 0x1a7   :  { %524 = vmatpush.msk.msra.mxu2 %vm413_vm12, %v553_v43 }
 0x1a9   :  { %525 = vmatpush.msk.msra.mxu2 %vm412_vm15, %v553_v43 }
 0x1ab   :  { %526 = vmatpush.msk.msra.mxu2 %vm411_vm5, %v553_v43 }
 0x1ad   :  { %527 = vmatpush.msk.msra.mxu2 %vm410_vm2, %v553_v43 }
 0x206   :  { %v228_v10 = vpop.f32.mrf.mxu0 }
 0x20d   :  { %v203_v11 = vpop.f32.mrf.mxu1 }
 0x20e   :  { %v229_v12 = vadd.f32 %v228_v10, %v203_v11  ;;  %v285_v16 = vpop.f32.mrf.mxu0 }
 0x210   :  { %v258_v15 = vadd.f32 %v255_v14, %v229_v12 }
 0x212   :  { %v288_v18 = vadd.f32 %v285_v16, %v258_v15 }
 0x216   :  { %v315_v22 = vpop.f32.mrf.mxu1 }
 0x217   :  { %v318_v23 = vadd.f32 %v315_v22, %v288_v18 }
 0x219   :  { %v324_v26 = vadd.f32 %v322_v19, %v318_v23 }
 0x21b   :  { %v325_v27 = vmax.f32 %v324_v26, 0.0 }
 0x21d   :  { %v337_v29 = vrot.slane %v325_v27, 6 }
 0x21f   :  { %v341_v30 = vsel %vm340_vm8, %v339_v28, %v337_v29 }
 0x220   :  { %458 = vmatmul.f32.vlgmr.msra.gmra.mxu2 %v341_v30 }
 0x2a3   :  { %v459_v31 = vpop.f32.mrf.mxu2 }
 0x2a4   :  { %v462_v32 = vmax.f32 %v459_v31, 1.0  ;;  %v481_v40 = vmul.f32 0.0625, %v459_v31 }
 0x2a6   :  { %v464_v33 = vrot.slane %v462_v32, 1  ;;  %v483_v45 = vrot.slane %v481_v40, 2 }
 0x2a8   :  { %542 = vrcp.f32 %v464_v33  ;;  %v477_v37 = vand.u32 2147483648, %v464_v33  ;;  %v475_v2 = vand.u32 2147483647, %v464_v33  ;;  %vm471_vm10 = vweird.f32 %v464_v33 }
 0x2aa   :  { %v478_v41 = vor.u32 1.1754944e-38, %v477_v37  ;;  %vm476_vm0 = vcmp.eq.f32.partialorder %v475_v2, 8.507059e+37 }
 0x2ae   :  { %v543_v34 = vpop.eup %542 }
 0x2af   :  { %v467_v35 = vmul.f32 %v543_v34, %v464_v33  ;;  %vm472_vm9 = vweird.f32 %v543_v34 }
 0x2b0   :  { %vm473_vm11 = vmor %vm471_vm10, %vm472_vm9 }
 0x2b1   :  { %v468_v36 = vsub.f32 1.0, %v467_v35 }
 0x2b3   :  { %v469_v38 = vmul.f32 %v543_v34, %v468_v36 }
 0x2b5   :  { %v470_v39 = vadd.f32 %v543_v34, %v469_v38 }
 0x2b7   :  { %v474_v42 = vsel %vm473_vm11, %v543_v34, %v470_v39 }
 0x2b8   :  { %v479_v43 = vsel %vm476_vm0, %v478_v41, %v474_v42 }
 0x2b9   :  { %v480_v44 = vmul.f32 %v479_v43, %v459_v31 }
 0x2bb   :  { %v485_v46 = vadd.f32 %v483_v45, %v480_v44 }
 0x2bd   :  { %486 = vst [vmem:[%s705_s2] sm:$0x1] %v485_v46 }

</bundles_post_ra>
